<compile_context>
chip_gen: v7x
topology: tpu7x:2x2x1
jax: 0.10.0
libtpu: 0.0.40
codegen_flags: <defaults>
</compile_context>

<pallas_src>
import math
from functools import partial

import jax
import jax.numpy as jnp
from jax.experimental import pallas as pl
from jax.experimental.pallas import tpu as pltpu

# ---- module hyper-parameters (SpatialCGNLx(inplanes=8, planes=4, groups=2, order=2)) ----
INPLANES = 8
PLANES = 4
GROUPS = 2
ORDER = 2
USE_SCALE = False
GN_EPS = 1e-5

# Taylor-expansion coefficients of the Gaussian RBF kernel (static, as in PyTorch:
# gamma=1e-4, beta=exp(-2*gamma), alpha_k = sqrt((2*gamma)^k / k! * beta)).
GAMMA = 1e-4
BETA = math.exp(-2.0 * GAMMA)
ALPHAS = tuple(
    math.sqrt((2.0 * GAMMA) ** k / math.factorial(k) * BETA) for k in range(ORDER + 1)
)


def _cgnlx_kernel(x_ref, wtpg_ref, wz_ref, gatt3_ref, ggn2_ref, gnw_ref, gnb_ref,
                  o_ref, *, bcp, bcin, coeffs, gn_eps):
    """Whole problem in one grid step.

    x_ref: (B*Cin, HW) lane-dense.  wtpg_ref: (3*B*Cp, B*Cin) batch-block-diag fused
    t/p/g weight (role-major rows).  wz_ref: (B*Cin, B*Cp) block-diag z-conv weight.
    gatt3_ref / ggn2_ref: block-ones group-aggregation matrices.  gnw/gnb: (B*Cin, 1).
    """
    x = x_ref[...]                                                        # (B*Cin, HW)

    # Fused t/p/g 1x1 convs over the whole batch: one MXU fire (e.g. (24,16)@(16,256)).
    tpg = jnp.dot(wtpg_ref[...], x, preferred_element_type=jnp.float32)  # (3*B*Cp, HW)
    t = tpg[0:bcp]                                                        # 8-row aligned
    p = tpg[bcp:2 * bcp]
    g = tpg[2 * bcp:3 * bcp]

    # Gaussian-RBF Taylor attention (order 2):
    #   att_k[b,grp] = sum_{rows in (b,grp)} sum_hw p^k * g
    # One block-ones matmul aggregates group rows (and broadcasts back per row); one
    # fused lane reduce over the stacked [g, p*g, p^2*g] finishes the sums.
    pg = p * g
    stack = jnp.concatenate([g, pg, p * pg], axis=0)                      # (3*B*Cp, HW)
    att = jnp.sum(
        jnp.dot(gatt3_ref[...], stack, preferred_element_type=jnp.float32),
        axis=-1, keepdims=True)                                           # (3*B*Cp, 1)
    a0 = att[0:bcp]
    a1 = att[bcp:2 * bcp]
    a2 = att[2 * bcp:3 * bcp]
    #   y = sum_k alpha_k^2 * att_k * t^k  (k=0 term broadcasts across HW)
    y = coeffs[0] * a0 + (coeffs[1] * a1) * t + (coeffs[2] * a2) * (t * t)  # (B*Cp, HW)

    # Grouped 1x1 z-conv: one block-diagonal (over batch and groups) matmul.
    z = jnp.dot(wz_ref[...], y, preferred_element_type=jnp.float32)       # (B*Cin, HW)

    # Single-pass GroupNorm: block-ones matmul + one lane reduce over stacked [z, z^2]
    # gives per-row group mean and E[z^2]; var = E[z^2] - mean^2.
    zz = jnp.concatenate([z, z * z], axis=0)                              # (2*B*Cin, HW)
    stats = jnp.sum(
        jnp.dot(ggn2_ref[...], zz, preferred_element_type=jnp.float32),
        axis=-1, keepdims=True)                                           # (2*B*Cin, 1)
    mean = stats[0:bcin]
    var = stats[bcin:2 * bcin] - mean * mean
    scale = jax.lax.rsqrt(var + gn_eps) * gnw_ref[...]                    # (B*Cin, 1)

    o_ref[...] = (z - mean) * scale + gnb_ref[...] + x


def prepare_cgnlx_params(wt, wp, wg, wz, gn_w, gn_b, *, batch, hw):
    """One-time packing of module parameters for the batch-fused kernel."""
    planes, inplanes = wt.shape
    cg = planes // GROUPS          # planes per attention group
    cig = inplanes // GROUPS       # inplanes per GN / z-conv group
    cpg = planes // GROUPS         # z-conv input planes per group
    eye_b = jnp.eye(batch, dtype=jnp.float32)

    # Fused t/p/g weight, batch-block-diagonal, rows role-major:
    #   rows [0:B*Cp)=t, [B*Cp:2*B*Cp)=p, [2*B*Cp:3*B*Cp)=g  (all 8-row aligned here).
    w_tpg_big = jnp.concatenate(
        [jnp.kron(eye_b, w.astype(jnp.float32)) for w in (wt, wp, wg)], axis=0)

    # Grouped z-conv expanded to a dense block-diagonal (Cin, Cp) weight, then
    # batch-block-diagonal.
    wz_full = jnp.zeros((inplanes, planes), jnp.float32)
    for gi in range(GROUPS):
        wz_full = wz_full.at[gi * cig:(gi + 1) * cig,
                             gi * cpg:(gi + 1) * cpg].set(
            wz[gi * cig:(gi + 1) * cig, :].astype(jnp.float32))
    wz_big = jnp.kron(eye_b, wz_full)                                     # (B*Cin, B*Cp)

    # Block-ones group-membership matrices: aggregate the rows of one (batch, group)
    # block and broadcast the sum back to each of its rows.
    g_att = jnp.kron(eye_b, jnp.kron(jnp.eye(GROUPS, dtype=jnp.float32),
                                     jnp.ones((cg, cg), jnp.float32)))
    g_att3 = jnp.kron(jnp.eye(3, dtype=jnp.float32), g_att)               # (3*B*Cp, ·)

    g_gn = jnp.kron(eye_b, jnp.kron(jnp.eye(GROUPS, dtype=jnp.float32),
                                    jnp.full((cig, cig), 1.0 / (cig * hw), jnp.float32)))
    g_gn2 = jnp.kron(jnp.eye(2, dtype=jnp.float32), g_gn)                 # (2*B*Cin, ·)

    gnw_col = jnp.tile(gn_w.astype(jnp.float32), batch).reshape(batch * inplanes, 1)
    gnb_col = jnp.tile(gn_b.astype(jnp.float32), batch).reshape(batch * inplanes, 1)

    return {"w_tpg": w_tpg_big, "wz": wz_big, "g_att3": g_att3, "g_gn2": g_gn2,
            "gnw": gnw_col, "gnb": gnb_col}


@jax.jit
def spatial_cgnlx(x, params):
    """x: (B, Cin, H, W) f32; params: output of prepare_cgnlx_params."""
    B, Cin, H, W = x.shape
    hw = H * W
    bcin = B * Cin
    bcp = params["w_tpg"].shape[0] // 3

    # NCHW -> (B*Cin, HW): free contiguous reshape, no transpose.
    x_flat = x.reshape(bcin, hw).astype(jnp.float32)

    cg = bcp // B // GROUPS
    scale_div = math.sqrt(cg * hw) if USE_SCALE else 1.0
    coeffs = tuple((a * a) / scale_div for a in ALPHAS)

    kern = partial(_cgnlx_kernel, bcp=bcp, bcin=bcin, coeffs=coeffs, gn_eps=GN_EPS)

    out_flat = pl.pallas_call(
        kern,
        out_shape=jax.ShapeDtypeStruct((bcin, hw), jnp.float32),
        grid=(1,),
        in_specs=[
            pl.BlockSpec((bcin, hw), lambda i: (0, 0)),
            pl.BlockSpec((3 * bcp, bcin), lambda i: (0, 0)),
            pl.BlockSpec((bcin, bcp), lambda i: (0, 0)),
            pl.BlockSpec((3 * bcp, 3 * bcp), lambda i: (0, 0)),
            pl.BlockSpec((2 * bcin, 2 * bcin), lambda i: (0, 0)),
            pl.BlockSpec((bcin, 1), lambda i: (0, 0)),
            pl.BlockSpec((bcin, 1), lambda i: (0, 0)),
        ],
        out_specs=pl.BlockSpec((bcin, hw), lambda i: (0, 0)),
        compiler_params=pltpu.CompilerParams(dimension_semantics=("arbitrary",)),
    )(x_flat, params["w_tpg"], params["wz"], params["g_att3"], params["g_gn2"],
      params["gnw"], params["gnb"])

    return out_flat.reshape(B, Cin, H, W)


# ------------------------ pure-JAX reference (PyTorch semantics) ------------------------
def ref_forward(x, wt, wp, wg, wz, gn_w, gn_b):
    B, Cin, H, W = x.shape
    planes = wt.shape[0]
    conv = lambda inp, w: jnp.einsum('oc,bchw->bohw', w, inp)
    t, p, g = conv(x, wt), conv(x, wp), conv(x, wg)

    cg = planes // GROUPS
    outs = []
    for gi in range(GROUPS):
        tg = t[:, gi * cg:(gi + 1) * cg].reshape(B, -1)
        pg = p[:, gi * cg:(gi + 1) * cg].reshape(B, -1)
        gg = g[:, gi * cg:(gi + 1) * cg].reshape(B, -1)
        y = jnp.zeros_like(tg)
        for k in range(ORDER + 1):
            att = ALPHAS[k] * jnp.sum(pg ** k * gg, axis=1, keepdims=True)
            if USE_SCALE:
                att = att / math.sqrt(cg * H * W)
            y = y + att * ALPHAS[k] * tg ** k
        outs.append(y.reshape(B, cg, H, W))
    y = jnp.concatenate(outs, axis=1)

    cig = Cin // GROUPS
    cpg = planes // GROUPS
    zouts = []
    for gi in range(GROUPS):
        wz_g = wz[gi * cig:(gi + 1) * cig, :]
        yg = y[:, gi * cpg:(gi + 1) * cpg]
        zouts.append(jnp.einsum('oc,bchw->bohw', wz_g, yg))
    z = jnp.concatenate(zouts, axis=1)

    zg = z.reshape(B, GROUPS, -1)
    mean = zg.mean(axis=2, keepdims=True)
    var = ((zg - mean) ** 2).mean(axis=2, keepdims=True)
    zn = ((zg - mean) / jnp.sqrt(var + GN_EPS)).reshape(B, Cin, H, W)
    zn = zn * gn_w[None, :, None, None] + gn_b[None, :, None, None]
    return zn + x


if __name__ == "__main__":
    key = jax.random.PRNGKey(0)
    ks = jax.random.split(key, 7)
    B, H, W = 2, 16, 16

    x = jax.random.normal(ks[0], (B, INPLANES, H, W), jnp.float32)
    wt = jax.random.normal(ks[1], (PLANES, INPLANES), jnp.float32) * 0.1
    wp = jax.random.normal(ks[2], (PLANES, INPLANES), jnp.float32) * 0.1
    wg = jax.random.normal(ks[3], (PLANES, INPLANES), jnp.float32) * 0.1
    wz = jax.random.normal(ks[4], (INPLANES, PLANES // GROUPS), jnp.float32) * 0.1
    gn_w = 1.0 + jax.random.normal(ks[5], (INPLANES,), jnp.float32) * 0.1
    gn_b = jax.random.normal(ks[6], (INPLANES,), jnp.float32) * 0.1

    # One-time parameter packing (outside the per-call critical path).
    params = prepare_cgnlx_params(wt, wp, wg, wz, gn_w, gn_b, batch=B, hw=H * W)

    out = spatial_cgnlx(x, params)
    out = jax.block_until_ready(out)

    ref = ref_forward(x, wt, wp, wg, wz, gn_w, gn_b)
    assert out.shape == (B, INPLANES, H, W)
    assert jnp.allclose(out, ref, atol=1e-4, rtol=1e-4), float(jnp.max(jnp.abs(out - ref)))
    print("KERNEL_OK")
</pallas_src>

<mosaic_0001>
module attributes {stable_mosaic.version = 11 : i64} {
  func.func @_cgnlx_kernel(%arg0: i32, %arg1: memref<16x256xf32, #tpu.memory_space<vmem>>, %arg2: memref<24x16xf32, #tpu.memory_space<vmem>>, %arg3: memref<16x8xf32, #tpu.memory_space<vmem>>, %arg4: memref<24x24xf32, #tpu.memory_space<vmem>>, %arg5: memref<32x32xf32, #tpu.memory_space<vmem>>, %arg6: memref<16x1xf32, #tpu.memory_space<vmem>>, %arg7: memref<16x1xf32, #tpu.memory_space<vmem>>, %arg8: memref<16x256xf32, #tpu.memory_space<vmem>>) attributes {dimension_semantics = [#tpu.dimension_semantics<arbitrary>], iteration_bounds = array<i64: 1>, scalar_prefetch = 0 : i64, scratch_operands = 0 : i64, tpu.core_type = #tpu.core_type<tc>, window_params = [{pipeline_mode = #tpu.pipeline_mode<synchronous>, transform_indices = @transform_0, window_bounds = array<i64: 16, 256>}, {pipeline_mode = #tpu.pipeline_mode<synchronous>, transform_indices = @transform_1, window_bounds = array<i64: 24, 16>}, {pipeline_mode = #tpu.pipeline_mode<synchronous>, transform_indices = @transform_2, window_bounds = array<i64: 16, 8>}, {pipeline_mode = #tpu.pipeline_mode<synchronous>, transform_indices = @transform_3, window_bounds = array<i64: 24, 24>}, {pipeline_mode = #tpu.pipeline_mode<synchronous>, transform_indices = @transform_4, window_bounds = array<i64: 32, 32>}, {pipeline_mode = #tpu.pipeline_mode<synchronous>, transform_indices = @transform_5, window_bounds = array<i64: 16, 1>}, {pipeline_mode = #tpu.pipeline_mode<synchronous>, transform_indices = @transform_6, window_bounds = array<i64: 16, 1>}, {pipeline_mode = #tpu.pipeline_mode<synchronous>, transform_indices = @transform_7, window_bounds = array<i64: 16, 256>}]} {
    %c0 = arith.constant 0 : index
    %c0_0 = arith.constant 0 : index
    %0 = vector.load %arg1[%c0, %c0_0] : memref<16x256xf32, #tpu.memory_space<vmem>>, vector<16x256xf32>
    %c0_1 = arith.constant 0 : index
    %c0_2 = arith.constant 0 : index
    %1 = vector.load %arg2[%c0_1, %c0_2] : memref<24x16xf32, #tpu.memory_space<vmem>>, vector<24x16xf32>
    %cst = arith.constant dense<0.000000e+00> : vector<24x256xf32>
    %2 = tpu.matmul %1, %0, %cst {dimension_numbers = #tpu.dot_dimension_numbers<[1], [0], [0], [1], [0, 0, 1, 1], [], []>} : vector<24x16xf32>, vector<16x256xf32>, vector<24x256xf32> -> vector<24x256xf32>
    %3 = vector.extract_strided_slice %2 {offsets = [0, 0], sizes = [8, 256], strides = [1, 1]} : vector<24x256xf32> to vector<8x256xf32>
    %4 = vector.extract_strided_slice %2 {offsets = [8, 0], sizes = [8, 256], strides = [1, 1]} : vector<24x256xf32> to vector<8x256xf32>
    %5 = vector.extract_strided_slice %2 {offsets = [16, 0], sizes = [8, 256], strides = [1, 1]} : vector<24x256xf32> to vector<8x256xf32>
    %6 = arith.mulf %4, %5 : vector<8x256xf32>
    %7 = arith.mulf %4, %6 : vector<8x256xf32>
    %8 = tpu.concatenate %5, %6, %7 in 0 : vector<8x256xf32>, vector<8x256xf32>, vector<8x256xf32> -> vector<24x256xf32>
    %c0_3 = arith.constant 0 : index
    %c0_4 = arith.constant 0 : index
    %9 = vector.load %arg4[%c0_3, %c0_4] : memref<24x24xf32, #tpu.memory_space<vmem>>, vector<24x24xf32>
    %cst_5 = arith.constant dense<0.000000e+00> : vector<24x256xf32>
    %10 = tpu.matmul %9, %8, %cst_5 {dimension_numbers = #tpu.dot_dimension_numbers<[1], [0], [0], [1], [0, 0, 1, 1], [], []>} : vector<24x24xf32>, vector<24x256xf32>, vector<24x256xf32> -> vector<24x256xf32>
    %cst_6 = arith.constant dense<0.000000e+00> : vector<24xf32>
    %11 = vector.multi_reduction <add>, %10, %cst_6 [1] : vector<24x256xf32> to vector<24xf32>
    %12 = vector.shape_cast %11 : vector<24xf32> to vector<24x1xf32>
    %13 = vector.extract_strided_slice %12 {offsets = [0, 0], sizes = [8, 1], strides = [1, 1]} : vector<24x1xf32> to vector<8x1xf32>
    %14 = vector.extract_strided_slice %12 {offsets = [8, 0], sizes = [8, 1], strides = [1, 1]} : vector<24x1xf32> to vector<8x1xf32>
    %15 = vector.extract_strided_slice %12 {offsets = [16, 0], sizes = [8, 1], strides = [1, 1]} : vector<24x1xf32> to vector<8x1xf32>
    %cst_7 = arith.constant 9.998000e-01 : f32
    %16 = vector.broadcast %cst_7 : f32 to vector<8x1xf32>
    %17 = arith.mulf %16, %13 : vector<8x1xf32>
    %cst_8 = arith.constant 1.999600e-04 : f32
    %18 = vector.broadcast %cst_8 : f32 to vector<8x1xf32>
    %19 = arith.mulf %18, %14 : vector<8x1xf32>
    %20 = vector.broadcast %19 : vector<8x1xf32> to vector<8x256xf32>
    %21 = arith.mulf %20, %3 : vector<8x256xf32>
    %22 = vector.broadcast %17 : vector<8x1xf32> to vector<8x256xf32>
    %23 = arith.addf %22, %21 : vector<8x256xf32>
    %cst_9 = arith.constant 1.999600e-08 : f32
    %24 = vector.broadcast %cst_9 : f32 to vector<8x1xf32>
    %25 = arith.mulf %24, %15 : vector<8x1xf32>
    %26 = arith.mulf %3, %3 : vector<8x256xf32>
    %27 = vector.broadcast %25 : vector<8x1xf32> to vector<8x256xf32>
    %28 = arith.mulf %27, %26 : vector<8x256xf32>
    %29 = arith.addf %23, %28 : vector<8x256xf32>
    %c0_10 = arith.constant 0 : index
    %c0_11 = arith.constant 0 : index
    %30 = vector.load %arg3[%c0_10, %c0_11] : memref<16x8xf32, #tpu.memory_space<vmem>>, vector<16x8xf32>
    %cst_12 = arith.constant dense<0.000000e+00> : vector<16x256xf32>
    %31 = tpu.matmul %30, %29, %cst_12 {dimension_numbers = #tpu.dot_dimension_numbers<[1], [0], [0], [1], [0, 0, 1, 1], [], []>} : vector<16x8xf32>, vector<8x256xf32>, vector<16x256xf32> -> vector<16x256xf32>
    %32 = arith.mulf %31, %31 : vector<16x256xf32>
    %33 = tpu.concatenate %31, %32 in 0 : vector<16x256xf32>, vector<16x256xf32> -> vector<32x256xf32>
    %c0_13 = arith.constant 0 : index
    %c0_14 = arith.constant 0 : index
    %34 = vector.load %arg5[%c0_13, %c0_14] : memref<32x32xf32, #tpu.memory_space<vmem>>, vector<32x32xf32>
    %cst_15 = arith.constant dense<0.000000e+00> : vector<32x256xf32>
    %35 = tpu.matmul %34, %33, %cst_15 {dimension_numbers = #tpu.dot_dimension_numbers<[1], [0], [0], [1], [0, 0, 1, 1], [], []>} : vector<32x32xf32>, vector<32x256xf32>, vector<32x256xf32> -> vector<32x256xf32>
    %cst_16 = arith.constant dense<0.000000e+00> : vector<32xf32>
    %36 = vector.multi_reduction <add>, %35, %cst_16 [1] : vector<32x256xf32> to vector<32xf32>
    %37 = vector.shape_cast %36 : vector<32xf32> to vector<32x1xf32>
    %38 = vector.extract_strided_slice %37 {offsets = [0, 0], sizes = [16, 1], strides = [1, 1]} : vector<32x1xf32> to vector<16x1xf32>
    %39 = vector.extract_strided_slice %37 {offsets = [16, 0], sizes = [16, 1], strides = [1, 1]} : vector<32x1xf32> to vector<16x1xf32>
    %40 = arith.mulf %38, %38 : vector<16x1xf32>
    %41 = arith.subf %39, %40 : vector<16x1xf32>
    %cst_17 = arith.constant 9.99999974E-6 : f32
    %42 = vector.broadcast %cst_17 : f32 to vector<16x1xf32>
    %43 = arith.addf %41, %42 : vector<16x1xf32>
    %44 = math.rsqrt %43 : vector<16x1xf32>
    %c0_18 = arith.constant 0 : index
    %c0_19 = arith.constant 0 : index
    %45 = vector.load %arg6[%c0_18, %c0_19] : memref<16x1xf32, #tpu.memory_space<vmem>>, vector<16x1xf32>
    %46 = arith.mulf %44, %45 : vector<16x1xf32>
    %47 = vector.broadcast %38 : vector<16x1xf32> to vector<16x256xf32>
    %48 = arith.subf %31, %47 : vector<16x256xf32>
    %49 = vector.broadcast %46 : vector<16x1xf32> to vector<16x256xf32>
    %50 = arith.mulf %48, %49 : vector<16x256xf32>
    %c0_20 = arith.constant 0 : index
    %c0_21 = arith.constant 0 : index
    %51 = vector.load %arg7[%c0_20, %c0_21] : memref<16x1xf32, #tpu.memory_space<vmem>>, vector<16x1xf32>
    %52 = vector.broadcast %51 : vector<16x1xf32> to vector<16x256xf32>
    %53 = arith.addf %50, %52 : vector<16x256xf32>
    %54 = arith.addf %53, %0 : vector<16x256xf32>
    %c0_22 = arith.constant 0 : index
    %c0_23 = arith.constant 0 : index
    %55 = vector.load %arg8[%c0_22, %c0_23] : memref<16x256xf32, #tpu.memory_space<vmem>>, vector<16x256xf32>
    tpu.vector_store %arg8[%c0_22, %c0_23], %54 {strides = array<i32>} : memref<16x256xf32, #tpu.memory_space<vmem>>, vector<16x256xf32>,
    return
  }
  func.func @transform_0(%arg0: i32) -> (i32, i32) {
    %c0_i32 = arith.constant 0 : i32
    %c0_i32_0 = arith.constant 0 : i32
    %c0_i32_1 = arith.constant 0 : i32
    return %c0_i32, %c0_i32_0 : i32, i32
  }
  func.func @transform_1(%arg0: i32) -> (i32, i32) {
    %c0_i32 = arith.constant 0 : i32
    %c0_i32_0 = arith.constant 0 : i32
    %c0_i32_1 = arith.constant 0 : i32
    return %c0_i32, %c0_i32_0 : i32, i32
  }
  func.func @transform_2(%arg0: i32) -> (i32, i32) {
    %c0_i32 = arith.constant 0 : i32
    %c0_i32_0 = arith.constant 0 : i32
    %c0_i32_1 = arith.constant 0 : i32
    return %c0_i32, %c0_i32_0 : i32, i32
  }
  func.func @transform_3(%arg0: i32) -> (i32, i32) {
    %c0_i32 = arith.constant 0 : i32
    %c0_i32_0 = arith.constant 0 : i32
    %c0_i32_1 = arith.constant 0 : i32
    return %c0_i32, %c0_i32_0 : i32, i32
  }
  func.func @transform_4(%arg0: i32) -> (i32, i32) {
    %c0_i32 = arith.constant 0 : i32
    %c0_i32_0 = arith.constant 0 : i32
    %c0_i32_1 = arith.constant 0 : i32
    return %c0_i32, %c0_i32_0 : i32, i32
  }
  func.func @transform_5(%arg0: i32) -> (i32, i32) {
    %c0_i32 = arith.constant 0 : i32
    %c0_i32_0 = arith.constant 0 : i32
    %c0_i32_1 = arith.constant 0 : i32
    return %c0_i32, %c0_i32_0 : i32, i32
  }
  func.func @transform_6(%arg0: i32) -> (i32, i32) {
    %c0_i32 = arith.constant 0 : i32
    %c0_i32_0 = arith.constant 0 : i32
    %c0_i32_1 = arith.constant 0 : i32
    return %c0_i32, %c0_i32_0 : i32, i32
  }
  func.func @transform_7(%arg0: i32) -> (i32, i32) {
    %c0_i32 = arith.constant 0 : i32
    %c0_i32_0 = arith.constant 0 : i32
    %c0_i32_1 = arith.constant 0 : i32
    return %c0_i32, %c0_i32_0 : i32, i32
  }
}

</mosaic_0001>

<bundles_post_ra>
// kernel: spatial_cgnlx.1
= control target key start
LH: loop header
LB: loop body
LE: loop exit
PB: predicated region body
PF: predicated region fallthrough
CT: control target
= control target key end

     0   :  { %v554_v3 = vmov 0.0   ;;  %vm33_vm0 = vcmask 130048   ;;  %vm133_vm1 = vcmask 195584   ;;  %vm250_vm2 = vcmask 64512   ;;  %s720_s0 = inlined_call_operand.vmem [shape: f32[16,256], index: 0, kind: input, shape index: {}]   ;;  %s721_s1 = inlined_call_operand.vmem [shape: f32[24,16], index: 1, kind: input, shape index: {}]   ;;  %s722_s3 = inlined_call_operand.vmem [shape: f32[24,24], index: 3, kind: input, shape index: {}]   ;;  %s723_s2 = inlined_call_operand.vmem [shape: f32[16,8], index: 2, kind: input, shape index: {}]   ;;  %s724_s4 = inlined_call_operand.vmem [shape: f32[32,32], index: 4, kind: input, shape index: {}]   ;;  %s725_s5 = inlined_call_operand.vmem [shape: f32[16,1], index: 5, kind: input, shape index: {}]   ;;  %s726_s6 = inlined_call_operand.vmem [shape: f32[16,1], index: 6, kind: input, shape index: {}]   ;;  %s727_s7 = inlined_call_operand.vmem [shape: f32[16,256], index: 7, kind: output, shape index: {}]  }
   0x1   :  { %v599_v0 = vld [vmem:[%s720_s0 + $0x8] sm:$0xff]  ;;  %v604_v1 = vld [vmem:[%s720_s0 + $0x18] sm:$0xff]  ;;  %v609_v2 = vld [vmem:[%s720_s0] sm:$0xff]  ;;  %107 = vmatprep.mubr.f32.mxu0 %v554_v3  ;;  %213 = vmatprep.mubr.f32.mxu1 %v554_v3  ;;  %vm342_vm3 = vcmask 261120  }
   0x2   :  { %v526_v4 = vpack.c.bf16 %v604_v1, %v599_v0  ;;  %v618_v5 = vld [vmem:[%s720_s0 + $0x10] sm:$0xff]  ;;  %v30_v7 = vld [vmem:[%s721_s1] sm:$0xff]  ;;  %v31_v8 = vld [vmem:[%s721_s1 + $0x8] sm:$0xff] }
   0x3   :  { %v528_v6 = vpack.c.bf16 %v618_v5, %v609_v2  ;;  %v32_v9 = vld [vmem:[%s721_s1 + $0x10] sm:$0xff]  ;;  %v130_v22 = vld [vmem:[%s722_s3] sm:$0xff]  ;;  %v131_v23 = vld [vmem:[%s722_s3 + $0x8] sm:$0xff] }
   0x4   :  { %527 = vmatprep.subr.bf16.mxu0 %v526_v4  ;;  %v132_v24 = vld [vmem:[%s722_s3 + $0x10] sm:$0xff]  ;;  %v248_v50 = vld [vmem:[%s723_s2] sm:$0xff]  ;;  %v249_v51 = vld [vmem:[%s723_s2 + $0x8] sm:$0xff] }
   0x5   :  { %529 = vmatpush1.bf16.msra.mxu0 %v528_v6  ;;  %v338_v4 = vld [vmem:[%s724_s4] sm:$0xff]  ;;  %v339_v6 = vld [vmem:[%s724_s4 + $0x8] sm:$0xff] }
   0x8   :  { %514 = vmatmul.mubr.msk.f32.vlgmr.msra.gmra.mrb[0].mxu0 %vm33_vm0, %v30_v7  ;;  %v340_v7 = vld [vmem:[%s724_s4 + $0x10] sm:$0xff] }
   0x9   :  { %113 = vmatprep.mubr.f32.mxu0 %v554_v3 }
   0xc   :  { %515 = vmatmul.mubr.msk.f32.gmra.mrb[2].mxu0 %vm33_vm0, %v31_v8  ;;  %v341_v8 = vld [vmem:[%s724_s4 + $0x18] sm:$0xff] }
   0xd   :  { %119 = vmatprep.mubr.f32.mxu0 %v554_v3 }
  0x10   :  { %516 = vmatmul.mubr.msk.f32.gmra.mrb[4].mxu0 %vm33_vm0, %v32_v9 }
  0x11   :  { %207 = vmatprep.mubr.f32.mxu0 %v554_v3 }
  0xdb   :  { %v109_v10 = vpop.f32.mrb[0].mxu0 }
  0xdc   :  { %v111_v11 = vpop.f32.mrb[1].mxu0  ;;  %v242_v36 = vmul.f32 %v109_v10, %v109_v10 }
  0xdd   :  { %v243_v37 = vmul.f32 %v111_v11, %v111_v11 }
  0xdf   :  { %v115_v12 = vpop.f32.mrb[2].mxu0 }
  0xe0   :  { %v117_v13 = vpop.f32.mrb[3].mxu0 }
  0xe3   :  { %v121_v14 = vpop.f32.mrb[4].mxu0 }
  0xe4   :  { %v126_v15 = vmul.f32 %v121_v14, %v115_v12  ;;  %v123_v16 = vpop.f32.mrb[5].mxu0 }
  0xe5   :  { %v127_v17 = vmul.f32 %v123_v16, %v117_v13 }
  0xe6   :  { %v128_v18 = vmul.f32 %v126_v15, %v115_v12  ;;  %v532_v19 = vpack.c.bf16 %v126_v15, %v121_v14 }
  0xe7   :  { %v129_v20 = vmul.f32 %v127_v17, %v117_v13  ;;  %v530_v21 = vpack.c.bf16 %v127_v17, %v123_v16 }
  0xe9   :  { %531 = vmatprep.subr.bf16.mxu0 %v530_v21  ;;  %542 = vmatprep.subr.bf16.mxu1 %v530_v21 }
  0xea   :  { %533 = vmatpush1.bf16.msra.mxu0 %v532_v19  ;;  %544 = vmatpush1.bf16.msra.mxu1 %v532_v19 }
  0xeb   :  { %147 = vmatprep.subr.mxu0 %v129_v20  ;;  %543 = vmatprep.subr.mxu1 %v129_v20  ;;  %v555_v20 = vmov 0  }
  0xec   :  { %548 = vset.pattern.permute.xlu1 %v555_v20  ;;  %549 = vset.pattern.permute.xlu0 %v555_v20 }
  0xee   :  { %148 = vmatpush1.msra.mxu0 %v128_v18  ;;  %545 = vmatpush1.msra.mxu1 %v128_v18 }
  0xef   :  { %518 = vmatmul.mubr.msk.f32.vlgmr.msra.gmra.mrb[0].mxu1 %vm133_vm1, %v131_v23  ;;  %517 = vmatmul.mubr.msk.f32.vlgmr.msra.gmra.mrb[6].mxu0 %vm133_vm1, %v130_v22 }
  0xf0   :  { %219 = vmatprep.mubr.f32.mxu1 %v554_v3  ;;  %321 = vmatprep.mubr.f32.mxu0 %v554_v3 }
  0xf3   :  { %519 = vmatmul.mubr.msk.f32.gmra.mrb[2].mxu1 %vm133_vm1, %v132_v24 }
  0xf4   :  { %419 = vmatprep.mubr.f32.mxu1 %v554_v3 }
 0x1c2   :  { %v215_v25 = vpop.f32.mrb[0].mxu1  ;;  %v209_v26 = vpop.f32.mrb[6].mxu0 }
 0x1c3   :  { %v217_v27 = vpop.f32.mrb[1].mxu1  ;;  %v211_v28 = vpop.f32.mrb[7].mxu0 }
 0x1c4   :  { %v229_v29 = vadd.f32 %v217_v27, %v215_v25  ;;  %v226_v30 = vadd.f32 %v211_v28, %v209_v26 }
 0x1c6   :  { %230 = vadd.xlane.f32.xlu0 %v229_v29  ;;  %v221_v31 = vpop.f32.mrb[2].mxu1 }
 0x1c7   :  { %v223_v32 = vpop.f32.mrb[3].mxu1 }
 0x1c8   :  { %v232_v33 = vadd.f32 %v223_v32, %v221_v31 }
 0x1ca   :  { %233 = vadd.xlane.f32.xlu1 %v232_v33  ;;  %227 = vadd.xlane.f32.xlu0 %v226_v30 }
 0x253   :  { %v231_v34 = vpop.xlane.xlu0 %230 }
 0x254   :  { %v236_v35 = vmul.f32 0.00019996, %v231_v34 }
 0x256   :  { %v237_v40 = vmul.f32 %v236_v35, %v109_v10  ;;  %v238_v41 = vmul.f32 %v236_v35, %v111_v11  ;;  %v464_v35 = vld [vmem:[%s725_s5] sm:$0xff] }
 0x257   :  { %v234_v38 = vpop.xlane.xlu1 %233  ;;  %v228_v39 = vpop.xlane.xlu0 %227 }
 0x258   :  { %v241_v42 = vmul.f32 1.9996e-08, %v234_v38  ;;  %v235_v43 = vmul.f32 0.9998, %v228_v39  ;;  %v465_v38 = vld [vmem:[%s725_s5 + $0x8] sm:$0xff] }
 0x25a   :  { %v244_v44 = vmul.f32 %v242_v36, %v241_v42  ;;  %v245_v45 = vmul.f32 %v243_v37, %v241_v42  ;;  %v239_v46 = vadd.f32 %v237_v40, %v235_v43  ;;  %v240_v47 = vadd.f32 %v238_v41, %v235_v43  ;;  %v486_v40 = vld [vmem:[%s726_s6] sm:$0xff]  ;;  %v487_v42 = vld [vmem:[%s726_s6 + $0x8] sm:$0xff] }
 0x25c   :  { %v246_v48 = vadd.f32 %v244_v44, %v239_v46  ;;  %v247_v49 = vadd.f32 %v245_v45, %v240_v47 }
 0x25e   :  { %257 = vmatprep.subr.mxu0 %v247_v49 }
 0x25f   :  { %258 = vmatpush1.msra.mxu0 %v246_v48 }
 0x260   :  { %520 = vmatmul.mubr.msk.f32.vlgmr.msra.gmra.mrb[8].mxu0 %vm250_vm2, %v248_v50 }
 0x261   :  { %327 = vmatprep.mubr.f32.mxu0 %v554_v3 }
 0x264   :  { %521 = vmatmul.mubr.msk.f32.gmra.mrb[10].mxu0 %vm250_vm2, %v249_v51 }
 0x333   :  { %v653_v52 = vpop.f32.mrb[8].mxu0 }
 0x334   :  { %v655_v53 = vpop.f32.mrb[9].mxu0  ;;  %v334_v55 = vmul.f32 %v653_v52, %v653_v52 }
 0x335   :  { %v335_v59 = vmul.f32 %v655_v53, %v655_v53 }
 0x337   :  { %v657_v54 = vpop.f32.mrb[10].mxu0 }
 0x338   :  { %v336_v56 = vmul.f32 %v657_v54, %v657_v54  ;;  %v536_v57 = vpack.c.bf16 %v657_v54, %v653_v52  ;;  %v665_v58 = vpop.f32.mrb[11].mxu0 }
 0x339   :  { %v337_v60 = vmul.f32 %v665_v58, %v665_v58  ;;  %v534_v61 = vpack.c.bf16 %v665_v58, %v655_v53 }
 0x33a   :  { %v540_v62 = vpack.c.bf16 %v336_v56, %v334_v55 }
 0x33b   :  { %v538_v63 = vpack.c.bf16 %v337_v60, %v335_v59  ;;  %535 = vmatprep.subr.bf16.mxu1 %v534_v61 }
 0x33c   :  { %537 = vmatpush1.bf16.msra.mxu1 %v536_v57 }
 0x33d   :  { %539 = vmatprep.subr.bf16.mxu1 %v538_v63 }
 0x340   :  { %541 = vmatpush1.bf16.msra.mxu1 %v540_v62 }
 0x343   :  { %522 = vmatmul.mubr.msk.f32.vlgmr.msra.gmra.mrb[4].mxu1 %vm342_vm3, %v338_v4 }
 0x344   :  { %425 = vmatprep.mubr.f32.mxu1 %v554_v3 }
 0x347   :  { %523 = vmatmul.mubr.msk.f32.gmra.mrb[6].mxu1 %vm342_vm3, %v339_v6 }
 0x348   :  { %431 = vmatprep.mubr.f32.mxu1 %v554_v3 }
 0x34b   :  { %524 = vmatmul.mubr.msk.f32.gmra.mrb[8].mxu1 %vm342_vm3, %v340_v7 }
 0x34c   :  { %437 = vmatprep.mubr.f32.mxu1 %v554_v3 }
 0x34f   :  { %525 = vmatmul.mubr.msk.f32.gmra.mrb[10].mxu1 %vm342_vm3, %v341_v8 }
 0x416   :  { %v421_v9 = vpop.f32.mrb[4].mxu1 }
 0x417   :  { %v423_v10 = vpop.f32.mrb[5].mxu1 }
 0x418   :  { %v444_v11 = vadd.f32 %v423_v10, %v421_v9 }
 0x41a   :  { %445 = vadd.xlane.f32.xlu1 %v444_v11  ;;  %v427_v12 = vpop.f32.mrb[6].mxu1 }
 0x41b   :  { %v429_v13 = vpop.f32.mrb[7].mxu1 }
 0x41c   :  { %v447_v14 = vadd.f32 %v429_v13, %v427_v12 }
 0x41e   :  { %448 = vadd.xlane.f32.xlu0 %v447_v14  ;;  %v433_v15 = vpop.f32.mrb[8].mxu1 }
 0x41f   :  { %v435_v16 = vpop.f32.mrb[9].mxu1 }
 0x420   :  { %v450_v17 = vadd.f32 %v435_v16, %v433_v15 }
 0x422   :  { %451 = vadd.xlane.f32.xlu1 %v450_v17  ;;  %v439_v18 = vpop.f32.mrb[10].mxu1 }
 0x423   :  { %v441_v19 = vpop.f32.mrb[11].mxu1 }
 0x424   :  { %v453_v3 = vadd.f32 %v441_v19, %v439_v18 }
 0x426   :  { %454 = vadd.xlane.f32.xlu0 %v453_v3 }
 0x4a7   :  { %v446_v21 = vpop.xlane.xlu1 %445 }
 0x4a8   :  { %v468_v22 = vsub.f32 %v653_v52, %v446_v21  ;;  %v469_v23 = vsub.f32 %v655_v53, %v446_v21  ;;  %v456_v27 = vmul.f32 %v446_v21, %v446_v21 }
 0x4ab   :  { %v449_v24 = vpop.xlane.xlu0 %448 }
 0x4ac   :  { %v470_v25 = vsub.f32 %v657_v54, %v449_v24  ;;  %v471_v26 = vsub.f32 %v665_v58, %v449_v24  ;;  %v457_v31 = vmul.f32 %v449_v24, %v449_v24 }
 0x4af   :  { %v452_v28 = vpop.xlane.xlu1 %451 }
 0x4b0   :  { %v458_v29 = vsub.f32 %v452_v28, %v456_v27 }
 0x4b2   :  { %v460_v30 = vadd.f32 1e-05, %v458_v29 }
 0x4b3   :  { %v455_v32 = vpop.xlane.xlu0 %454 }
 0x4b4   :  { %550 = vrsqrt.f32 %v460_v30  ;;  %v459_v33 = vsub.f32 %v455_v32, %v457_v31 }
 0x4b6   :  { %v461_v34 = vadd.f32 1e-05, %v459_v33 }
 0x4b8   :  { %552 = vrsqrt.f32 %v461_v34 }
 0x4be   :  { %v551_v36 = vpop.eup %550 }
 0x4bf   :  { %v466_v37 = vmul.f32 %v551_v36, %v464_v35 }
 0x4c1   :  { %474 = vperm.xlu1 %548, %v466_v37  }
 0x4c2   :  { %v553_v39 = vpop.eup %552 }
 0x4c3   :  { %v467_v41 = vmul.f32 %v553_v39, %v465_v38 }
 0x4c5   :  { %490 = vperm.xlu1 %548, %v486_v40   ;;  %479 = vperm.xlu0 %549, %v467_v41  }
 0x4c9   :  { %495 = vperm.xlu1 %548, %v487_v42  }
 0x540   :  { %v475_v43 = vpop.permute.xlu1 %474 }
 0x541   :  { %v482_v44 = vmul.f32 %v475_v43, %v468_v22  ;;  %v483_v45 = vmul.f32 %v475_v43, %v469_v23 }
 0x544   :  { %v491_v46 = vpop.permute.xlu1 %490  ;;  %v480_v47 = vpop.permute.xlu0 %479 }
 0x545   :  { %v498_v48 = vadd.f32 %v491_v46, %v482_v44  ;;  %v499_v49 = vadd.f32 %v491_v46, %v483_v45  ;;  %v484_v52 = vmul.f32 %v480_v47, %v470_v25  ;;  %v485_v53 = vmul.f32 %v480_v47, %v471_v26 }
 0x547   :  { %v502_v50 = vadd.f32 %v498_v48, %v609_v2  ;;  %v503_v51 = vadd.f32 %v499_v49, %v599_v0 }
 0x548   :  { %v496_v54 = vpop.permute.xlu1 %495 }
 0x549   :  { %506 = vst [vmem:[%s727_s7] sm:$0xff] %v502_v50  ;;  %507 = vst [vmem:[%s727_s7 + $0x8] sm:$0xff] %v503_v51  ;;  %v500_v55 = vadd.f32 %v496_v54, %v484_v52  ;;  %v501_v56 = vadd.f32 %v496_v54, %v485_v53 }
 0x54b   :  { %v504_v57 = vadd.f32 %v500_v55, %v618_v5  ;;  %v505_v58 = vadd.f32 %v501_v56, %v604_v1 }
 0x54d   :  { %508 = vst [vmem:[%s727_s7 + $0x10] sm:$0xff] %v504_v57  ;;  %509 = vst [vmem:[%s727_s7 + $0x18] sm:$0xff] %v505_v58 }

</bundles_post_ra>
